<compile_context>
chip_gen: v7x
topology: tpu7x:2x2x1
jax: 0.10.0
libtpu: 0.0.40
codegen_flags: <defaults>
</compile_context>

<pallas_src>
import jax
import jax.numpy as jnp
from jax.experimental import pallas as pl
from jax.experimental.pallas import tpu as pltpu


def prepare_expert_params(w1, b1, w2, b2, dtype=jnp.float32):
    """One-time weight prep (call at model init, NOT per forward).

    Inputs (stacked over experts, nn.Linear weights pre-transposed to (in,out)):
      w1: (E, I, H)   b1: (E, H)   w2: (E, H, O)   b2: (E, O)

    Returns:
      w1_cat: (I, E*H)     experts concatenated along the fc1 output dim
      b1_cat: (1, E*H)
      w2_bd : (E*H, E*O)   block-diagonal fc2 weight (exact: off-blocks are 0)
      b2_cat: (1, E*O)

    `dtype` controls the matmul-operand dtype (use jnp.bfloat16 on v6e/v7x to
    halve weight bytes; accumulation stays f32 either way). Biases stay f32.
    """
    E, I, H = w1.shape
    O = w2.shape[2]

    w1_cat = jnp.transpose(w1, (1, 0, 2)).reshape(I, E * H)
    b1_cat = b1.reshape(1, E * H)

    w2_bd = jnp.zeros((E * H, E * O), w2.dtype)
    for e in range(E):
        w2_bd = w2_bd.at[e * H:(e + 1) * H, e * O:(e + 1) * O].set(w2[e])
    b2_cat = b2.reshape(1, E * O)

    return (w1_cat.astype(dtype),
            b1_cat.astype(jnp.float32),
            w2_bd.astype(dtype),
            b2_cat.astype(jnp.float32))


def expert_kernel(x_ref, w1_ref, b1_ref, w2_ref, b2_ref, o_ref):
    # fc1: (B, I) @ (I, E*H), f32 MXU accumulation, then bias + ReLU.
    h = jnp.dot(x_ref[...], w1_ref[...], preferred_element_type=jnp.float32)
    h = jnp.maximum(h + b1_ref[...], 0.0)
    # Dropout(p=0.3) -> identity in eval/inference mode.
    # fc2: (B, E*H) @ (E*H, E*O) against the block-diagonal weight, bias add.
    h = h.astype(w2_ref.dtype)  # no-op for f32; keeps bf16 MXU path if bf16.
    out = jnp.dot(h, w2_ref[...], preferred_element_type=jnp.float32)
    o_ref[...] = (out + b2_ref[...]).astype(o_ref.dtype)


def fused_experts_forward(x, w1_cat, b1_cat, w2_bd, b2_cat):
    """x: (B, I); params from prepare_expert_params.

    Returns a dense (B, E*O) array; expert e's output is [:, e*O:(e+1)*O].
    Single pallas_call, no grid: everything fits VMEM on all generations.
    """
    B, I = x.shape
    EH = w1_cat.shape[1]
    EO = w2_bd.shape[1]

    x = x.astype(w1_cat.dtype)
    w_itemsize = jnp.dtype(w1_cat.dtype).itemsize
    f32_itemsize = jnp.dtype(jnp.float32).itemsize

    cost = pl.CostEstimate(
        flops=2 * B * I * EH + 2 * B * EH * EO,
        transcendentals=0,
        bytes_accessed=(x.size + w1_cat.size + w2_bd.size) * w_itemsize
                       + (b1_cat.size + b2_cat.size + B * EO) * f32_itemsize,
    )

    vmem_spec = pl.BlockSpec(memory_space=pltpu.MemorySpace.VMEM)
    return pl.pallas_call(
        expert_kernel,
        out_shape=jax.ShapeDtypeStruct((B, EO), jnp.float32),
        in_specs=[vmem_spec] * 5,
        out_specs=vmem_spec,
        cost_estimate=cost,
    )(x, w1_cat, b1_cat, w2_bd, b2_cat)


def expert_forward(x, params):
    """Single/multi Expert forward. `params` = prepare_expert_params(...) output,
    prepared ONCE at init (padding/concat is not in the per-call path)."""
    return fused_experts_forward(x, *params)


def reference_forward(x, w1, b1, w2, b2):
    h = jnp.maximum(x @ w1 + b1, 0.0)
    return h @ w2 + b2


if __name__ == "__main__":
    # Shapes consistent with Expert(input_size, output_size, hidden_size),
    # fused over a small MMoE expert bank.
    batch = 8
    input_size = 32
    hidden_size = 64
    output_size = 16
    num_experts = 4

    key = jax.random.PRNGKey(0)
    kx, k1, kb1, k2, kb2 = jax.random.split(key, 5)

    x = jax.random.normal(kx, (batch, input_size), dtype=jnp.float32)

    # nn.Linear-style init (uniform +/- 1/sqrt(fan_in)), stored pre-transposed
    # as (in, out), stacked over experts.
    lim1 = 1.0 / (input_size ** 0.5)
    w1 = jax.random.uniform(k1, (num_experts, input_size, hidden_size),
                            jnp.float32, -lim1, lim1)
    b1 = jax.random.uniform(kb1, (num_experts, hidden_size),
                            jnp.float32, -lim1, lim1)
    lim2 = 1.0 / (hidden_size ** 0.5)
    w2 = jax.random.uniform(k2, (num_experts, hidden_size, output_size),
                            jnp.float32, -lim2, lim2)
    b2 = jax.random.uniform(kb2, (num_experts, output_size),
                            jnp.float32, -lim2, lim2)

    # One-time weight prep (hoisted out of the per-forward path).
    params = prepare_expert_params(w1, b1, w2, b2)

    # Fused multi-expert forward: one kernel invocation, no grid.
    out_slab = expert_forward(x, params)
    jax.block_until_ready(out_slab)
    assert out_slab.shape == (batch, num_experts * output_size)

    # Unpack dense (B, E*O) slab -> per-expert (E, B, O) for verification.
    out = out_slab.reshape(batch, num_experts, output_size)
    out = jnp.transpose(out, (1, 0, 2))

    ref = jax.vmap(
        lambda W1, B1, W2, B2: reference_forward(x, W1, B1, W2, B2)
    )(w1, b1, w2, b2)
    assert out.shape == ref.shape
    assert jnp.allclose(out, ref, atol=1e-5, rtol=1e-5), "fused mismatch vs reference"

    # Single-expert path (the original Expert nn.Module semantics, E=1).
    params_single = prepare_expert_params(w1[:1], b1[:1], w2[:1], b2[:1])
    single = expert_forward(x, params_single)
    jax.block_until_ready(single)
    assert single.shape == (batch, output_size)
    assert jnp.allclose(single, ref[0], atol=1e-5, rtol=1e-5), \
        "single-expert mismatch"

    print("KERNEL_OK")
</pallas_src>

<mosaic_0001>
module attributes {stable_mosaic.version = 11 : i64} {
  func.func @expert_kernel(%arg0: memref<8x32xf32, #tpu.memory_space<vmem>>, %arg1: memref<32x256xf32, #tpu.memory_space<vmem>>, %arg2: memref<1x256xf32, #tpu.memory_space<vmem>>, %arg3: memref<256x64xf32, #tpu.memory_space<vmem>>, %arg4: memref<1x64xf32, #tpu.memory_space<vmem>>, %arg5: memref<8x64xf32, #tpu.memory_space<vmem>>) attributes {dimension_semantics = [], scalar_prefetch = 0 : i64, scratch_operands = 0 : i64, tpu.core_type = #tpu.core_type<tc>} {
    %c0 = arith.constant 0 : index
    %c0_0 = arith.constant 0 : index
    %0 = vector.load %arg0[%c0, %c0_0] : memref<8x32xf32, #tpu.memory_space<vmem>>, vector<8x32xf32>
    %c0_1 = arith.constant 0 : index
    %c0_2 = arith.constant 0 : index
    %1 = vector.load %arg1[%c0_1, %c0_2] : memref<32x256xf32, #tpu.memory_space<vmem>>, vector<32x256xf32>
    %cst = arith.constant dense<0.000000e+00> : vector<8x256xf32>
    %2 = tpu.matmul %0, %1, %cst {dimension_numbers = #tpu.dot_dimension_numbers<[1], [0], [0], [1], [0, 0, 1, 1], [], []>} : vector<8x32xf32>, vector<32x256xf32>, vector<8x256xf32> -> vector<8x256xf32>
    %c0_3 = arith.constant 0 : index
    %c0_4 = arith.constant 0 : index
    %3 = vector.load %arg2[%c0_3, %c0_4] : memref<1x256xf32, #tpu.memory_space<vmem>>, vector<1x256xf32>
    %4 = vector.broadcast %3 : vector<1x256xf32> to vector<8x256xf32>
    %5 = arith.addf %2, %4 : vector<8x256xf32>
    %cst_5 = arith.constant 0.000000e+00 : f32
    %6 = vector.broadcast %cst_5 : f32 to vector<8x256xf32>
    %7 = arith.maximumf %5, %6 : vector<8x256xf32>
    %c0_6 = arith.constant 0 : index
    %c0_7 = arith.constant 0 : index
    %8 = vector.load %arg3[%c0_6, %c0_7] : memref<256x64xf32, #tpu.memory_space<vmem>>, vector<256x64xf32>
    %cst_8 = arith.constant dense<0.000000e+00> : vector<8x64xf32>
    %9 = tpu.matmul %7, %8, %cst_8 {dimension_numbers = #tpu.dot_dimension_numbers<[1], [0], [0], [1], [0, 0, 1, 1], [], []>} : vector<8x256xf32>, vector<256x64xf32>, vector<8x64xf32> -> vector<8x64xf32>
    %c0_9 = arith.constant 0 : index
    %c0_10 = arith.constant 0 : index
    %10 = vector.load %arg4[%c0_9, %c0_10] : memref<1x64xf32, #tpu.memory_space<vmem>>, vector<1x64xf32>
    %11 = vector.broadcast %10 : vector<1x64xf32> to vector<8x64xf32>
    %12 = arith.addf %9, %11 : vector<8x64xf32>
    %c0_11 = arith.constant 0 : index
    %c0_12 = arith.constant 0 : index
    %13 = vector.load %arg5[%c0_11, %c0_12] : memref<8x64xf32, #tpu.memory_space<vmem>>, vector<8x64xf32>
    tpu.vector_store %arg5[%c0_11, %c0_12], %12 {strides = array<i32>} : memref<8x64xf32, #tpu.memory_space<vmem>>, vector<8x64xf32>,
    return
  }
}

</mosaic_0001>

<bundles_post_ra>
// kernel: tpu_custom_call.1
= control target key start
LH: loop header
LB: loop body
LE: loop exit
PB: predicated region body
PF: predicated region fallthrough
CT: control target
= control target key end

     0   :  { %v347_v7 = vmov 0.0   ;;  %vm42_vm0 = vcmask 261120   ;;  %s520_s0 = inlined_call_operand.vmem [shape: f32[8,32], index: 0, kind: input, shape index: {}]   ;;  %s521_s1 = inlined_call_operand.vmem [shape: f32[32,256], index: 1, kind: input, shape index: {}]   ;;  %s522_s2 = inlined_call_operand.vmem [shape: f32[1,256], index: 2, kind: input, shape index: {}]   ;;  %s523_s3 = inlined_call_operand.vmem [shape: f32[256,64], index: 3, kind: input, shape index: {}]   ;;  %s524_s4 = inlined_call_operand.vmem [shape: f32[1,64], index: 4, kind: input, shape index: {}]   ;;  %s525_s5 = inlined_call_operand.hbm [shape: f32[8,64], index: 5, kind: output, shape index: {}]  }
   0x1   :  { %v23_v0 = vld [vmem:[%s521_s1 + $0x8] sm:$0xff]  ;;  %v25_v1 = vld [vmem:[%s521_s1 + $0x18] sm:$0xff]  ;;  %v22_v2 = vld [vmem:[%s521_s1] sm:$0xff]  ;;  %110 = vmatprep.mubr.f32.mxu0 %v347_v7 }
   0x2   :  { %v281_v3 = vpack.c.bf16 %v25_v1, %v23_v0  ;;  %v24_v4 = vld [vmem:[%s521_s1 + $0x10] sm:$0xff]  ;;  %v27_v5 = vld [vmem:[%s521_s1 + $0x28] sm:$0xff]  ;;  %v29_v6 = vld [vmem:[%s521_s1 + $0x38] sm:$0xff] }
   0x3   :  { %v283_v8 = vpack.c.bf16 %v24_v4, %v22_v2  ;;  %v285_v9 = vpack.c.bf16 %v29_v6, %v27_v5  ;;  %v26_v10 = vld [vmem:[%s521_s1 + $0x20] sm:$0xff]  ;;  %v28_v11 = vld [vmem:[%s521_s1 + $0x30] sm:$0xff]  ;;  %v136_v13 = vld [vmem:[%s523_s3 + $0x88] sm:$0xff] }
   0x4   :  { %282 = vmatprep.subr.bf16.mxu0 %v281_v3  ;;  %v135_v12 = vld [vmem:[%s523_s3 + $0x80] sm:$0xff]  ;;  %v287_v15 = vpack.c.bf16 %v28_v11, %v26_v10  ;;  %v120_v17 = vld [vmem:[%s523_s3 + $0x8] sm:$0xff]  ;;  %v137_v18 = vld [vmem:[%s523_s3 + $0x90] sm:$0xff] }
   0x5   :  { %v119_v14 = vld [vmem:[%s523_s3] sm:$0xff]  ;;  %284 = vmatpush1.bf16.msra.mxu0 %v283_v8  ;;  %v289_v16 = vpack.c.bf16 %v136_v13, %v135_v12  ;;  %v138_v19 = vld [vmem:[%s523_s3 + $0x98] sm:$0xff]  ;;  %v121_v22 = vld [vmem:[%s523_s3 + $0x10] sm:$0xff] }
   0x6   :  { %286 = vmatprep.subr.bf16.mxu0 %v285_v9  ;;  %v291_v20 = vpack.c.bf16 %v120_v17, %v119_v14  ;;  %v293_v21 = vpack.c.bf16 %v138_v19, %v137_v18  ;;  %v122_v23 = vld [vmem:[%s523_s3 + $0x18] sm:$0xff]  ;;  %v139_v24 = vld [vmem:[%s523_s3 + $0xa0] sm:$0xff]  ;;  %v140_v25 = vld [vmem:[%s523_s3 + $0xa8] sm:$0xff] }
   0x7   :  { %290 = vmatprep.subr.bf16.mxu1 %v289_v16  ;;  %v295_v26 = vpack.c.bf16 %v122_v23, %v121_v22  ;;  %v21_v27 = vld [vmem:[%s520_s0] sm:$0xff]  ;;  %v297_v28 = vpack.c.bf16 %v140_v25, %v139_v24  ;;  %v124_v30 = vld [vmem:[%s523_s3 + $0x28] sm:$0xff]  ;;  %v141_v31 = vld [vmem:[%s523_s3 + $0xb0] sm:$0xff] }
   0x8   :  { %292 = vmatpush3.bf16.msra.mxu1 %v291_v20  ;;  %v123_v29 = vld [vmem:[%s523_s3 + $0x20] sm:$0xff]  ;;  %v142_v32 = vld [vmem:[%s523_s3 + $0xb8] sm:$0xff]  ;;  %v125_v35 = vld [vmem:[%s523_s3 + $0x30] sm:$0xff] }
   0x9   :  { %288 = vmatpush1.bf16.msra.mxu0 %v287_v15  ;;  %294 = vmatprep.subr.bf16.mxu1 %v293_v21  ;;  %v299_v33 = vpack.c.bf16 %v124_v30, %v123_v29  ;;  %v301_v34 = vpack.c.bf16 %v142_v32, %v141_v31  ;;  %v126_v36 = vld [vmem:[%s523_s3 + $0x38] sm:$0xff] }
   0xc   :  { %244 = vmatmul.mubr.msk.f32.vlgmr.msra.gmra.mrb[0].mxu0 %vm42_vm0, %v21_v27  ;;  %296 = vmatpush3.bf16.msra.mxu1 %v295_v26 }
   0xd   :  { %298 = vmatprep.subr.bf16.mxu1 %v297_v28 }
   0xe   :  { %10 = vsyncpa [#allocation3], 0  ;;  %v143_v37 = vld [vmem:[%s523_s3 + $0xc0] sm:$0xff]  ;;  %v144_v38 = vld [vmem:[%s523_s3 + $0xc8] sm:$0xff]  ;;  %v303_v39 = vpack.c.bf16 %v126_v36, %v125_v35  ;;  %v32_v62 = vlaneseq  ;;  %s348_s23 = smov [#allocation2]   ;;  %vm228_vm1 = vcmask 523264  }
   0xf   :  { %v305_v40 = vpack.c.bf16 %v144_v38, %v143_v37  ;;  %v127_v41 = vld [vmem:[%s523_s3 + $0x40] sm:$0xff]  ;;  %v128_v42 = vld [vmem:[%s523_s3 + $0x48] sm:$0xff]  ;;  %v145_v43 = vld [vmem:[%s523_s3 + $0xd0] sm:$0xff]  ;;  %s236_s24 = sshll.u32 %s348_s23, 4  ;;  %s237_s24 = int_to_ptr.vmem [resolvable:$true] %s236_s24 }
  0x10   :  { %300 = vmatpush3.bf16.msra.mxu1 %v299_v33  ;;  %v146_v44 = vld [vmem:[%s523_s3 + $0xd8] sm:$0xff]  ;;  %v307_v45 = vpack.c.bf16 %v128_v42, %v127_v41  ;;  %v129_v47 = vld [vmem:[%s523_s3 + $0x50] sm:$0xff]  ;;  %v147_v49 = vld [vmem:[%s523_s3 + $0xe0] sm:$0xff]  ;;  %v33_v63 = vshrl.u32 %v32_v62, 7  ;;  %p328_p1 = scmp.lt.s32.totalorder %s237_s24, %s237_s24 }
  0x11   :  { %302 = vmatprep.subr.bf16.mxu1 %v301_v34  ;;  %v309_v46 = vpack.c.bf16 %v146_v44, %v145_v43  ;;  %v130_v48 = vld [vmem:[%s523_s3 + $0x58] sm:$0xff]  ;;  %v148_v50 = vld [vmem:[%s523_s3 + $0xe8] sm:$0xff]  ;;  %v131_v53 = vld [vmem:[%s523_s3 + $0x60] sm:$0xff] }
  0x12   :  { %v311_v51 = vpack.c.bf16 %v130_v48, %v129_v47  ;;  %v313_v52 = vpack.c.bf16 %v148_v50, %v147_v49  ;;  %v132_v54 = vld [vmem:[%s523_s3 + $0x68] sm:$0xff]  ;;  %v149_v56 = vld [vmem:[%s523_s3 + $0xf0] sm:$0xff]  ;;  %v150_v57 = vld [vmem:[%s523_s3 + $0xf8] sm:$0xff]  ;;  %v34_v0 = vsub.s32 0, %v33_v63  ;;  %v38_v2 = vsub.s32 1, %v33_v63 }
  0x13   :  { %v315_v55 = vpack.c.bf16 %v132_v54, %v131_v53  ;;  %v317_v58 = vpack.c.bf16 %v150_v57, %v149_v56  ;;  %v133_v59 = vld [vmem:[%s523_s3 + $0x70] sm:$0xff]  ;;  %v134_v60 = vld [vmem:[%s523_s3 + $0x78] sm:$0xff]  ;;  %v30_v1 = vld [vmem:[%s522_s2] sm:$0x3]  ;;  %s323_s2 = scalar_lea.vmem %s237_s24, 128 }
  0x14   :  { %304 = vmatpush3.bf16.msra.mxu1 %v303_v39  ;;  %v319_v61 = vpack.c.bf16 %v134_v60, %v133_v59  ;;  %v35_v3 = vrot.slane %v30_v1, %v34_v0  ;;  %v39_v4 = vrot.slane %v30_v1, %v38_v2  ;;  %v245_v12 = vld [vmem:[%s524_s4] ss:$0 sm:$0xff]  ;;  %p324_p0 = scmp.ne.s32.totalorder %s237_s24, %s323_s2  ;;  %p329_p2 = scmp.lt.s32.totalorder %s323_s2, %s323_s2 }
  0x15   :  { %306 = vmatprep.subr.bf16.mxu1 %v305_v40 }
  0x16   :  { %p330_p3 = por %p329_p2, %p328_p1 }
  0x18   :  { %308 = vmatpush3.bf16.msra.mxu1 %v307_v45  ;;  %p331_p4 = pnand %p330_p3, %p324_p0 }
  0x19   :  { %310 = vmatprep.subr.bf16.mxu1 %v309_v46 }
  0x1c   :  { %312 = vmatpush3.bf16.msra.mxu1 %v311_v51 }
  0x1d   :  { %314 = vmatprep.subr.bf16.mxu1 %v313_v52 }
  0x20   :  { %316 = vmatpush3.bf16.msra.mxu1 %v315_v55 }
  0x21   :  { %318 = vmatprep.subr.bf16.mxu1 %v317_v58 }
  0x24   :  { %320 = vmatpush3.bf16.msra.mxu1 %v319_v61 }
  0xdf   :  { %v112_v5 = vpop.f32.mrb[0].mxu0 }
  0xe0   :  { %v113_v6 = vadd.f32 %v112_v5, %v35_v3  ;;  %v114_v7 = vpop.f32.mrb[1].mxu0 }
  0xe1   :  { %v115_v8 = vadd.f32 %v114_v7, %v39_v4 }
  0xe2   :  { %v117_v10 = vmax.f32 %v113_v6, 0.0 }
  0xe3   :  { %v118_v9 = vmax.f32 %v115_v8, 0.0 }
  0xe5   :  { %222 = vmatprep.mubr.f32.mxu1 %v118_v9 }
  0xe6   :  { %223 = vmatmul.mubr.f32.vlgmr.msra.gmra.mrb[0].mxu1 %v117_v10 }
 0x1b9   :  { %v278_v11 = vpop.f32.mrb[0].mxu1 }
 0x1ba   :  { %v279_v13 = vpop.f32.mrb[1].mxu1 }
 0x1bb   :  { %v280_v14 = vadd.f32 %v279_v13, %v278_v11 }
 0x1bd   :  { %v225_v15 = vadd.f32 %v280_v14, %v245_v12 }
 0x1bf   :  { %229 = vst.msk [vmem:[#allocation2] sm:$0xff] %vm228_vm1, %v225_v15 }
 0x1c0   :  { %334 = shalt.err (!%p331_p4)
}
 0x1c1   :  { %s335_s27 = scalar_lea.hbm %s525_s5, 128 }
 0x1c2   :  { %p336_p5 = scmp.ne.s32.totalorder %s525_s5, %s335_s27  ;;  %p339_p6 = scmp.lt.u32.totalorder %s335_s27, %s525_s5 }
 0x1c4   :  { %p341_p7 = pnand %p339_p6, %p336_p5 }
 0x1c6   :  { %344 = shalt.err (!%p341_p7)
}
 0x1c7   :  { %239 = dma.vmem_to_hbm [thread:$0]  %s237_s24, 128, %s525_s5, [#allocation3]  }
 0x1c8   :  { %345 = dma.done.wait [#allocation3], 128  }
 0x1c9   :  { %346 = vsyncadd [#allocation3], 4294967168 }
 0x1ca   :  { %243 = vsyncpa [#allocation3], 1 }

</bundles_post_ra>
